<compile_context>
chip_gen: v6e
topology: v6e:2x2x1
jax: 0.10.0
libtpu: 0.0.40
codegen_flags: <defaults>
</compile_context>

<pallas_src>
import jax
import jax.numpy as jnp
from jax.experimental import pallas as pl
from jax.experimental.pallas import tpu as pltpu


def _norm_block_kernel(x_ref, o_ref):
    # x_ref: (B, C, H, W) — a block of whole samples; o_ref: (B, C, H_out, W).
    B, C, H, W = x_ref.shape
    H_out = o_ref.shape[2]
    n_odd = H // 2  # number of valid "down" taps (odd input rows that exist)

    # ---- MaxPool along H: kernel=3, stride=2, padding=1 (implicit -inf pad) ----
    # Output row ho takes input rows {2ho-1, 2ho, 2ho+1} ∩ [0, H).
    center = x_ref[:, :, pl.ds(0, H_out, 2), :]          # rows 0, 2, 4, ...
    pooled = center
    if n_odd > 0:
        odd = x_ref[:, :, pl.ds(1, n_odd, 2), :]         # rows 1, 3, 5, ...
        neg_row = jnp.full((B, C, 1, W), -jnp.inf, dtype=x_ref.dtype)
        # "down" tap (row 2ho+1) = odd[ho]; missing for the last row when H is odd.
        down = odd if n_odd == H_out else jnp.concatenate([odd, neg_row], axis=2)
        pooled = jnp.maximum(pooled, down)
        # "up" tap (row 2ho-1) = odd[ho-1]; missing for ho == 0.
        if H_out > 1:
            up = jnp.concatenate([neg_row, odd[:, :, : H_out - 1, :]], axis=2)
            pooled = jnp.maximum(pooled, up)

    # ---- Per-sample min-max normalization (reduce over C, H_out, W) ----
    mx = pooled
    mn = pooled
    for ax in (3, 2, 1):
        mx = jnp.max(mx, axis=ax, keepdims=True)
        mn = jnp.min(mn, axis=ax, keepdims=True)
    mx = mx.astype(jnp.float32)
    mn = mn.astype(jnp.float32)
    # One reciprocal per sample + broadcast multiply (no per-element divide).
    # NOTE: like the PyTorch module, a constant sample (mx == mn) yields inf/nan.
    inv = 1.0 / (mx - mn)
    o_ref[...] = ((pooled.astype(jnp.float32) - mn) * inv).astype(o_ref.dtype)


def _pick_samples_per_block(n, sample_bytes, target_bytes=2 << 20):
    """Largest divisor of n whose input tile is <= target, keeping >= 2 grid steps."""
    if n <= 1:
        return 1
    cap = max(1, min(target_bytes // max(sample_bytes, 1), n // 2))
    for b in range(int(cap), 0, -1):
        if n % b == 0:
            return b
    return 1


def norm_block(x):
    """x: (N, C, H, W) float -> (N, C, H_out, W), matching the PyTorch NormBlock."""
    N, C, H, W = x.shape
    H_out = (H + 2 * 1 - 3) // 2 + 1

    itemsize = jnp.dtype(x.dtype).itemsize
    sample_in = C * H * W * itemsize
    sample_out = C * H_out * W * itemsize
    B = _pick_samples_per_block(N, sample_in)
    grid_n = N // B

    # VMEM budget: double-buffered in/out tiles + in-kernel f32 temporaries +
    # headroom, capped below the physical per-core VMEM of this generation.
    need = 2 * B * (sample_in + sample_out) + 8 * B * C * H_out * W * 4
    try:
        phys_vmem = pltpu.get_tpu_info().vmem_capacity_bytes
    except Exception:
        phys_vmem = 64 << 20  # assume the smallest (v7x per-TensorCore VMEM)
    vmem_limit = int(min(max(need + (2 << 20), 16 << 20), (phys_vmem * 3) // 4))
    # TODO(synk): samples too large for one VMEM block (mainly v7x, 64 MiB/TC) need a
    # two-pass scheme: pass 1 tiles C and emits per-sample min/max, pass 2 re-pools
    # each tile and normalizes with the scalar-prefetched min/max.

    return pl.pallas_call(
        _norm_block_kernel,
        out_shape=jax.ShapeDtypeStruct((N, C, H_out, W), x.dtype),
        grid_spec=pltpu.PrefetchScalarGridSpec(
            num_scalar_prefetch=0,
            grid=(grid_n,),
            in_specs=[pl.BlockSpec((B, C, H, W), lambda n: (n, 0, 0, 0))],
            out_specs=pl.BlockSpec((B, C, H_out, W), lambda n: (n, 0, 0, 0)),
        ),
        compiler_params=pltpu.CompilerParams(
            dimension_semantics=("parallel",),
            vmem_limit_bytes=vmem_limit,
        ),
    )(x)


def _reference(x):
    """Plain-JAX reference matching the PyTorch module."""
    N, C, H, W = x.shape
    H_out = (H + 2 - 3) // 2 + 1
    neg_inf = jnp.array(-jnp.inf, x.dtype)
    xpad = jnp.pad(x, ((0, 0), (0, 0), (1, 1), (0, 0)), constant_values=neg_inf)
    pooled = jnp.stack(
        [jnp.max(xpad[:, :, 2 * ho:2 * ho + 3, :], axis=2) for ho in range(H_out)],
        axis=2,
    )
    mn = pooled.min(axis=(1, 2, 3), keepdims=True)
    mx = pooled.max(axis=(1, 2, 3), keepdims=True)
    return (pooled - mn) / (mx - mn)


if __name__ == "__main__":
    key = jax.random.PRNGKey(0)
    x = jax.random.normal(key, (2, 4, 16, 16), dtype=jnp.float32)

    out = jax.block_until_ready(norm_block(x))

    ref = _reference(x)
    assert out.shape == (2, 4, 8, 16), out.shape
    assert jnp.allclose(out, ref, atol=1e-5, rtol=1e-5), "mismatch vs reference"

    print("KERNEL_OK")
</pallas_src>

<mosaic_0001>
module attributes {stable_mosaic.version = 11 : i64} {
  func.func @_norm_block_kernel(%arg0: i32, %arg1: memref<1x4x16x16xf32, #tpu.memory_space<vmem>>, %arg2: memref<1x4x8x16xf32, #tpu.memory_space<vmem>>) attributes {dimension_semantics = [#tpu.dimension_semantics<parallel>], iteration_bounds = array<i64: 2>, scalar_prefetch = 0 : i64, scratch_operands = 0 : i64, tpu.core_type = #tpu.core_type<tc>, window_params = [{transform_indices = @transform_0, window_bounds = array<i64: 1, 4, 16, 16>}, {transform_indices = @transform_1, window_bounds = array<i64: 1, 4, 8, 16>}]} {
    %c0 = arith.constant 0 : index
    %c0_0 = arith.constant 0 : index
    %c0_1 = arith.constant 0 : index
    %c0_2 = arith.constant 0 : index
    %0 = tpu.strided_load %arg1[%c0, %c0_0, %c0_1, %c0_2] {strides = array<i32: 1, 1, 2, 1>} : memref<1x4x16x16xf32, #tpu.memory_space<vmem>>, vector<1x4x8x16xf32>
    %c0_3 = arith.constant 0 : index
    %c0_4 = arith.constant 0 : index
    %c1 = arith.constant 1 : index
    %c0_5 = arith.constant 0 : index
    %1 = tpu.strided_load %arg1[%c0_3, %c0_4, %c1, %c0_5] {strides = array<i32: 1, 1, 2, 1>} : memref<1x4x16x16xf32, #tpu.memory_space<vmem>>, vector<1x4x8x16xf32>
    %cst = arith.constant 0xFF800000 : f32
    %2 = vector.broadcast %cst : f32 to vector<1x4x1x16xf32>
    %3 = arith.maximumf %0, %1 : vector<1x4x8x16xf32>
    %4 = vector.extract_strided_slice %1 {offsets = [0, 0, 0, 0], sizes = [1, 4, 7, 16], strides = [1, 1, 1, 1]} : vector<1x4x8x16xf32> to vector<1x4x7x16xf32>
    %5 = tpu.concatenate %2, %4 in 2 : vector<1x4x1x16xf32>, vector<1x4x7x16xf32> -> vector<1x4x8x16xf32>
    %6 = arith.maximumf %3, %5 : vector<1x4x8x16xf32>
    %cst_6 = arith.constant dense<0xFF800000> : vector<1x4x8xf32>
    %7 = vector.multi_reduction <maximumf>, %6, %cst_6 [3] : vector<1x4x8x16xf32> to vector<1x4x8xf32>
    %8 = vector.shape_cast %7 : vector<1x4x8xf32> to vector<1x4x8x1xf32>
    %cst_7 = arith.constant dense<0x7F800000> : vector<1x4x8xf32>
    %9 = vector.multi_reduction <minimumf>, %6, %cst_7 [3] : vector<1x4x8x16xf32> to vector<1x4x8xf32>
    %10 = vector.shape_cast %9 : vector<1x4x8xf32> to vector<1x4x8x1xf32>
    %cst_8 = arith.constant dense<0xFF800000> : vector<1x4x1xf32>
    %11 = vector.multi_reduction <maximumf>, %8, %cst_8 [2] : vector<1x4x8x1xf32> to vector<1x4x1xf32>
    %12 = vector.shape_cast %11 : vector<1x4x1xf32> to vector<1x4x1x1xf32>
    %cst_9 = arith.constant dense<0x7F800000> : vector<1x4x1xf32>
    %13 = vector.multi_reduction <minimumf>, %10, %cst_9 [2] : vector<1x4x8x1xf32> to vector<1x4x1xf32>
    %14 = vector.shape_cast %13 : vector<1x4x1xf32> to vector<1x4x1x1xf32>
    %cst_10 = arith.constant dense<0xFF800000> : vector<1x1x1xf32>
    %15 = vector.multi_reduction <maximumf>, %12, %cst_10 [1] : vector<1x4x1x1xf32> to vector<1x1x1xf32>
    %16 = vector.shape_cast %15 : vector<1x1x1xf32> to vector<1x1x1x1xf32>
    %cst_11 = arith.constant dense<0x7F800000> : vector<1x1x1xf32>
    %17 = vector.multi_reduction <minimumf>, %14, %cst_11 [1] : vector<1x4x1x1xf32> to vector<1x1x1xf32>
    %18 = vector.shape_cast %17 : vector<1x1x1xf32> to vector<1x1x1x1xf32>
    %19 = arith.subf %16, %18 : vector<1x1x1x1xf32>
    %cst_12 = arith.constant 1.000000e+00 : f32
    %20 = vector.broadcast %cst_12 : f32 to vector<1x1x1x1xf32>
    %21 = arith.divf %20, %19 : vector<1x1x1x1xf32>
    %22 = vector.broadcast %18 : vector<1x1x1x1xf32> to vector<1x4x8x16xf32>
    %23 = arith.subf %6, %22 : vector<1x4x8x16xf32>
    %24 = vector.broadcast %21 : vector<1x1x1x1xf32> to vector<1x4x8x16xf32>
    %25 = arith.mulf %23, %24 : vector<1x4x8x16xf32>
    %c0_13 = arith.constant 0 : index
    %c0_14 = arith.constant 0 : index
    %c0_15 = arith.constant 0 : index
    %c0_16 = arith.constant 0 : index
    %26 = vector.load %arg2[%c0_13, %c0_14, %c0_15, %c0_16] : memref<1x4x8x16xf32, #tpu.memory_space<vmem>>, vector<1x4x8x16xf32>
    tpu.vector_store %arg2[%c0_13, %c0_14, %c0_15, %c0_16], %25 {strides = array<i32>} : memref<1x4x8x16xf32, #tpu.memory_space<vmem>>, vector<1x4x8x16xf32>,
    return
  }
  func.func @transform_0(%arg0: i32) -> (i32, i32, i32, i32) {
    %c0_i32 = arith.constant 0 : i32
    %c0_i32_0 = arith.constant 0 : i32
    %c0_i32_1 = arith.constant 0 : i32
    %c0_i32_2 = arith.constant 0 : i32
    return %arg0, %c0_i32, %c0_i32_0, %c0_i32_1 : i32, i32, i32, i32
  }
  func.func @transform_1(%arg0: i32) -> (i32, i32, i32, i32) {
    %c0_i32 = arith.constant 0 : i32
    %c0_i32_0 = arith.constant 0 : i32
    %c0_i32_1 = arith.constant 0 : i32
    %c0_i32_2 = arith.constant 0 : i32
    return %arg0, %c0_i32, %c0_i32_0, %c0_i32_1 : i32, i32, i32, i32
  }
}

</mosaic_0001>

<bundles_post_ra>
// kernel: tpu_custom_call.1
= control target key start
LH: loop header
LB: loop body
LE: loop exit
PB: predicated region body
PF: predicated region fallthrough
CT: control target
= control target key end

     0   :  { %6 = vsyncpa [#allocation3], 0  ;;  %s732_s0 = inlined_call_operand.hbm [shape: f32[2,4,16,16], index: 0, kind: input, shape index: {}]   ;;  %s733_s1 = inlined_call_operand.hbm [shape: f32[2,4,8,16], index: 1, kind: output, shape index: {}]  }
   0x1   :  { %8 = vsyncpa [#allocation3 + $0x1], 0 }
   0x2   :  { %9 = vsyncpa [#allocation4], 0 }
   0x3   :  { %11 = vsyncpa [#allocation4 + $0x1], 0  ;;  %s541_s6 = smov 0   ;;  %s543_s7 = smov 0  }
   0x4   :  { %s545_s8 = smov 0   ;;  %s547_s9 = smov 0  }
   0x5 LB: > { %s562_s10 = sadd.s32 4294967295, %s523_s9   ;;  %s356_s11 = sadd.s32 4294967294, %s523_s9   ;;  %s523_s9 = sphi %s547_s9, %s748_s9   ;;  %s519_s8 = sphi %s545_s8, %s747_s8   ;;  %s515_s7 = sphi %s543_s7, %s746_s7   ;;  %s511_s6 = sphi %s541_s6, %s745_s6  }
   0x6   : > { %s566_s12 = sadd.s32 1, %s523_s9   ;;  %s24_s13 = sadd.s32 1, %s519_s8 }
   0x7   : > { %s21_s14 = ssub.s32 %s523_s9, %s566_s12  ;;  %p31_p0 = scmp.ne.s32.totalorder %s519_s8, %s515_s7 }
   0x8   : > { %p22_p1 = scmp.eq.s32.totalorder %s21_s14, 0  ;;  %p32_p2 = scmp.eq.s32.totalorder %s523_s9, 0 }
   0x9   : > { %p37_p3 = scmp.ne.s32.totalorder %s515_s7, %s511_s6  ;;  %p38_p4 = scmp.eq.s32.totalorder %s562_s10, 0 }
   0xa   : > { %s578_s15 = scalar_select %p22_p1, %s519_s8, %s24_s13  }
   0xb   : > { %p580_p5 = por %p32_p2, %p31_p0  ;;  %p584_p6 = por %p38_p4, %p37_p3 }
   0xc   : > { %p61_p7 = scmp.eq.s32.totalorder %s562_s10, 1  ;;  %p67_p8 = scmp.eq.s32.totalorder %s356_s11, 1 }
   0xd   : > { %s737_s17 = scalar_select %p584_p6, 1, 0 }
   0xe   : > { %p391_p10 = scmp.lt.s32.totalorder %s523_s9, 2  ;;  %p591_p11 = por %p61_p7, %p31_p0 }
   0xf   : > { %p595_p12 = por %p67_p8, %p37_p3  ;;  %s87_s20 = sand.u32 1, %s519_s8  }
  0x10   : > { %s738_s18 = scalar_select %p591_p11, 1, 0 }
  0x11   : > { %s739_s19 = scalar_select %p595_p12, 1, 0 }
  0x12   : > { %s377_s21 = sshll.u32 %s523_s9, 10  ;;  %s359_s22 = sshll.u32 %s87_s20, 6 }
  0x13   : > { %s604_s25 = scalar_lea.hbm %s732_s0, %s377_s21  ;;  %s91_s26 = scalar_lea.vmem [#allocation2], %s359_s22 }
  0x14   : > { %s98_s27 = sshll.u32 %s91_s26, 4  ;;  %p608_p13 = pnand %p391_p10, %p580_p5  ;;  %s612_s27 = int_to_ptr.vmem [resolvable:$true] %s98_s27 }
  0x15   : > { %s614_s29 = scalar_lea.sflag [#allocation3], %s87_s20  ;;  %s431_s30 = scalar_lea.hbm %s604_s25, 1024 }
  0x16   : > { %p432_p0 = scmp.ne.s32.totalorder %s604_s25, %s431_s30  ;;  %p433_p1 = pneg %p608_p13 }
  0x17   : > { %s436_s4 = scalar_lea.hbm %s732_s0, 2048  ;;  %p437_p4 = scmp.lt.s32.totalorder %s604_s25, %s732_s0 }
  0x18   : > { %p434_p2 = pnand %p433_p1, %p432_p0  ;;  %p438_p5 = scmp.lt.s32.totalorder %s436_s4, %s431_s30 }
  0x1a   : > { %p435_p3 = pneg %p434_p2  ;;  %p439_p7 = por %p438_p5, %p437_p4 }
  0x1c   : > { %p440_p8 = pnand %p439_p7, %p435_p3 }
  0x1e   : > { %443 = shalt.err (!%p440_p8)
}
  0x1f   : > { %s444_s13 = scalar_lea.vmem %s612_s27, 1024  ;;  %s525_s14 = smov [#allocation2]  }
  0x20   : > { %p445_p10 = scmp.ne.s32.totalorder %s612_s27, %s444_s13  ;;  %s449_s16 = sshll.u32 %s525_s14, 4  ;;  %s450_s16 = int_to_ptr.vmem [resolvable:$false] %s449_s16 }
  0x21   : > { %s451_s20 = scalar_lea.vmem %s450_s16, 2048  ;;  %p452_p2 = scmp.lt.s32.totalorder %s612_s27, %s450_s16 }
  0x22   : > { %p447_p9 = pnand %p445_p10, %p433_p1  ;;  %p453_p12 = scmp.lt.s32.totalorder %s451_s20, %s444_s13 }
  0x24   : > { %p448_p0 = pneg %p447_p9  ;;  %p454_p11 = por %p453_p12, %p452_p2 }
  0x26   : > { %p455_p6 = pnand %p454_p11, %p448_p0 }
  0x28   : > { %458 = shalt.err (!%p455_p6)
}
  0x29   : > { %s526_s21 = smov 128   ;;  %s527_s22 = smov 8  }
  0x2a   : > { %386 = dma.hbm_to_vmem [thread:$0]  (!%p608_p13), %s604_s25, 1024, %s612_s27, %s614_s29, %s526_s21, %s526_s21, %s527_s22  }
  0x2b   : > { %p362_p9 = scmp.ge.s32.totalorder %s523_s9, 1  ;;  %p106_p1 = scmp.lt.s32.totalorder %s523_s9, 3 }
  0x2d   : > { %p107_p3 = pnand %p362_p9, %p106_p1 }
  0x2e   : > { %s638_s23 = sand.u32 (!%p107_p3), 1, %s515_s7   ;;  %p741_p6 = scmp.ne.s32.totalorder (!%p107_p3), %s737_s17, 0 }
  0x2f   : > { %110 = sbr.rel (%p107_p3) target bundleno = 260 (0x104), region = 24  ;;  %s363_s24 = sshll.u32 (!%p107_p3), %s638_s23, 6 }
  0x30   : > { %s113_s26 = scalar_lea.sflag (!%p107_p3), [#allocation3], %s638_s23  ;;  %s116_s30 = scalar_lea.vmem (!%p107_p3), [#allocation2], %s363_s24 }
  0x34   : > { %502 = dma.done.wait (%p741_p6), %s113_s26, 1024  }
  0x35   : > { %504 = vsyncadd (%p741_p6), %s113_s26, 4294966272  ;;  %vm166_vm0 = vcmask 1040384   ;;  %v366_v0 = vld [vmem:[%s116_s30 + $0x20] ss:$2 sm:$0xff]  ;;  %v370_v1 = vld [vmem:[%s116_s30 + $0x21] ss:$2 sm:$0xff] }
  0x36   : > { %v135_v2 = vld [vmem:[%s116_s30] ss:$2 sm:$0xff]  ;;  %v152_v3 = vmax.f32 %v366_v0, %v370_v1  ;;  %v160_v4 = vrot.slane %v370_v1, 7  ;;  %v368_v5 = vld [vmem:[%s116_s30 + $0x1] ss:$2 sm:$0xff]  ;;  %vm175_vm1 = vcmask 130048  }
  0x37   : > { %v367_v6 = vld [vmem:[%s116_s30 + $0x30] ss:$2 sm:$0xff]  ;;  %v150_v7 = vmax.f32 %v135_v2, %v368_v5  ;;  %v158_v8 = vrot.slane %v368_v5, 7  ;;  %v371_v9 = vld [vmem:[%s116_s30 + $0x31] ss:$2 sm:$0xff]  ;;  %s364_s17 = sshll.u32 %s638_s23, 5 }
  0x38   : > { %v365_v10 = vld [vmem:[%s116_s30 + $0x10] ss:$2 sm:$0xff]  ;;  %v169_v11 = vsel %vm166_vm0, -inf, %v160_v4  ;;  %v153_v12 = vmax.f32 %v367_v6, %v371_v9  ;;  %v161_v13 = vrot.slane %v371_v9, 7  ;;  %v369_v14 = vld [vmem:[%s116_s30 + $0x11] ss:$2 sm:$0xff] }
  0x39   : > { %v647_v15 = vmax.f32 %v152_v3, %v169_v11  ;;  %v167_v16 = vsel %vm166_vm0, -inf, %v158_v8  ;;  %v151_v17 = vmax.f32 %v365_v10, %v369_v14  ;;  %v159_v18 = vrot.slane %v369_v14, 7  ;;  %s378_s25 = sshll.u32 %s562_s10, 9  ;;  %s134_s27 = scalar_lea.vmem [#allocation5], %s364_s17 }
  0x3a   : > { %v650_v19 = vmax.f32 %v150_v7, %v167_v16  ;;  %v170_v20 = vsel %vm166_vm0, -inf, %v161_v13  ;;  %s283_s28 = sshll.u32 %s134_s27, 4  ;;  %s683_s3 = scalar_lea.hbm %s733_s1, %s378_s25  ;;  %s685_s28 = int_to_ptr.vmem [resolvable:$true] %s283_s28 }
  0x3b   : > { %v182_v21 = vsel %vm175_vm1, %v647_v15, -inf  ;;  %v655_v22 = vmax.f32 %v153_v12, %v170_v20  ;;  %v168_v23 = vsel %vm166_vm0, -inf, %v159_v18  ;;  %v194_v31 = vsel %vm175_vm1, %v647_v15, inf  ;;  %s270_s10 = scalar_lea.sflag [#allocation4], %s638_s23  ;;  %s459_s4 = scalar_lea.vmem %s685_s28, 512 }
  0x3c   : > { %183 = vmax.xlane.f32.xlu1 %v182_v21  ;;  %v176_v24 = vsel %vm175_vm1, %v650_v19, -inf  ;;  %v660_v25 = vmax.f32 %v151_v17, %v168_v23  ;;  %v188_v29 = vsel %vm175_vm1, %v650_v19, inf  ;;  %p460_p11 = scmp.ne.s32.totalorder %s685_s28, %s459_s4  ;;  %p742_p12 = scmp.ne.s32.totalorder %s738_s18, 0 }
  0x3d   : > { %177 = vmax.xlane.f32.xlu0 %v176_v24  ;;  %v185_v26 = vsel %vm175_vm1, %v655_v22, -inf  ;;  %v197_v30 = vsel %vm175_vm1, %v655_v22, inf  ;;  %s528_s5 = smov [#allocation5]  }
  0x3e   : > { %v179_v27 = vsel %vm175_vm1, %v660_v25, -inf  ;;  %v191_v28 = vsel %vm175_vm1, %v660_v25, inf  ;;  %p461_p13 = pnand %p460_p11, %p742_p12  ;;  %s463_s11 = sshll.u32 %s528_s5, 4  ;;  %s464_s11 = int_to_ptr.vmem [resolvable:$false] %s463_s11 }
  0x3f   : > { %s465_s13 = scalar_lea.vmem %s464_s11, 1024  ;;  %p466_p5 = scmp.lt.s32.totalorder %s685_s28, %s464_s11 }
  0x40   : > { %186 = vmax.xlane.f32.xlu1 %v185_v26  ;;  %p462_p4 = pneg %p461_p13  ;;  %p467_p7 = scmp.lt.s32.totalorder %s465_s13, %s459_s4 }
  0x41   : > { %180 = vmax.xlane.f32.xlu0 %v179_v27 }
  0x42   : > { %p468_p8 = por %p467_p7, %p466_p5 }
  0x44   : > { %192 = vmin.xlane.f32.xlu1 %v191_v28  ;;  %p469_p10 = pnand %p468_p8, %p462_p4 }
  0x45   : > { %189 = vmin.xlane.f32.xlu0 %v188_v29 }
  0x48   : > { %198 = vmin.xlane.f32.xlu1 %v197_v30 }
  0x49   : > { %195 = vmin.xlane.f32.xlu0 %v194_v31 }
  0xc5   : > { %v184_v32 = vpop.xlane.xlu1 %183 }
  0xc6   : > { %v212_v33 = vrot.slane %v184_v32, 4  ;;  %v178_v34 = vpop.xlane.xlu0 %177 }
  0xc7   : > { %v200_v35 = vrot.slane %v178_v34, 4 }
  0xc8   : > { %v213_v37 = vmax.f32 %v184_v32, %v212_v33 }
  0xc9   : > { %v187_v36 = vpop.xlane.xlu1 %186  ;;  %v201_v40 = vmax.f32 %v178_v34, %v200_v35 }
  0xca   : > { %v218_v38 = vrot.slane %v187_v36, 4  ;;  %v181_v39 = vpop.xlane.xlu0 %180  ;;  %v214_v45 = vrot.slane %v213_v37, 2 }
  0xcb   : > { %v206_v41 = vrot.slane %v181_v39, 4  ;;  %v202_v49 = vrot.slane %v201_v40, 2 }
  0xcc   : > { %v219_v42 = vmax.f32 %v187_v36, %v218_v38  ;;  %v215_v57 = vmax.f32 %v213_v37, %v214_v45 }
  0xcd   : > { %v207_v43 = vmax.f32 %v181_v39, %v206_v41  ;;  %v193_v44 = vpop.xlane.xlu1 %192  ;;  %v203_v61 = vmax.f32 %v201_v40, %v202_v49 }
  0xce   : > { %v220_v46 = vrot.slane %v219_v42, 2  ;;  %v230_v47 = vrot.slane %v193_v44, 4  ;;  %v190_v48 = vpop.xlane.xlu0 %189  ;;  %v216_v6 = vrot.slane %v215_v57, 1 }
  0xcf   : > { %v208_v50 = vrot.slane %v207_v43, 2  ;;  %v224_v51 = vrot.slane %v190_v48, 4  ;;  %v204_v8 = vrot.slane %v203_v61, 1 }
  0xd0   : > { %v231_v52 = vmin.f32 %v193_v44, %v230_v47  ;;  %v221_v53 = vmax.f32 %v219_v42, %v220_v46  ;;  %v217_v17 = vmax.f32 %v215_v57, %v216_v6 }
  0xd1   : > { %v209_v54 = vmax.f32 %v207_v43, %v208_v50  ;;  %v225_v55 = vmin.f32 %v190_v48, %v224_v51  ;;  %v199_v56 = vpop.xlane.xlu1 %198  ;;  %v205_v20 = vmax.f32 %v203_v61, %v204_v8 }
  0xd2   : > { %v232_v58 = vrot.slane %v231_v52, 2  ;;  %v242_v59 = vrot.slane %v199_v56, 4  ;;  %v196_v60 = vpop.xlane.xlu0 %195  ;;  %v222_v2 = vrot.slane %v221_v53, 1 }
  0xd3   : > { %v226_v62 = vrot.slane %v225_v55, 2  ;;  %v236_v63 = vrot.slane %v196_v60, 4  ;;  %v210_v3 = vrot.slane %v209_v54, 1 }
  0xd4   : > { %v233_v0 = vmin.f32 %v231_v52, %v232_v58  ;;  %v243_v1 = vmin.f32 %v199_v56, %v242_v59  ;;  %v223_v13 = vmax.f32 %v221_v53, %v222_v2 }
  0xd5   : > { %v227_v4 = vmin.f32 %v225_v55, %v226_v62  ;;  %v237_v5 = vmin.f32 %v196_v60, %v236_v63  ;;  %v211_v14 = vmax.f32 %v209_v54, %v210_v3 }
  0xd6   : > { %v244_v7 = vrot.slane %v243_v1, 2  ;;  %v234_v9 = vrot.slane %v233_v0, 1  ;;  %v249_v27 = vmax.f32 %v217_v17, %v223_v13 }
  0xd7   : > { %v228_v10 = vrot.slane %v227_v4, 1  ;;  %v238_v11 = vrot.slane %v237_v5, 2  ;;  %v248_v28 = vmax.f32 %v205_v20, %v211_v14 }
  0xd8   : > { %v245_v12 = vmin.f32 %v243_v1, %v244_v7  ;;  %v235_v21 = vmin.f32 %v233_v0, %v234_v9 }
  0xd9   : > { %v239_v16 = vmin.f32 %v237_v5, %v238_v11  ;;  %v229_v23 = vmin.f32 %v227_v4, %v228_v10  ;;  %v250_v32 = vmax.f32 %v248_v28, %v249_v27 }
  0xda   : > { %v246_v18 = vrot.slane %v245_v12, 1 }
  0xdb   : > { %v240_v24 = vrot.slane %v239_v16, 1  ;;  %v251_v30 = vmin.f32 %v229_v23, %v235_v21 }
  0xdc   : > { %v247_v26 = vmin.f32 %v245_v12, %v246_v18 }
  0xdd   : > { %v241_v29 = vmin.f32 %v239_v16, %v240_v24 }
  0xdf   : > { %v252_v31 = vmin.f32 %v241_v29, %v247_v26 }
  0xe1   : > { %v253_v33 = vmin.f32 %v251_v30, %v252_v31 }
  0xe3   : > { %v254_v34 = vsub.f32 %v250_v32, %v253_v33  ;;  %v257_v35 = vsub.f32 %v650_v19, %v253_v33  ;;  %v258_v36 = vsub.f32 %v660_v25, %v253_v33  ;;  %v259_v37 = vsub.f32 %v647_v15, %v253_v33 }
  0xe4   : > { %v260_v38 = vsub.f32 %v655_v22, %v253_v33 }
  0xe5   : > { %429 = vrcp.f32 %v254_v34 }
  0xf2   : > { %v430_v39 = vpop.eup %429 }
  0xf3   : > { %v261_v40 = vmul.f32 %v430_v39, %v257_v35  ;;  %v262_v41 = vmul.f32 %v430_v39, %v258_v36  ;;  %v263_v19 = vmul.f32 %v430_v39, %v259_v37  ;;  %v264_v25 = vmul.f32 %v430_v39, %v260_v38 }
  0xf5   : > { %265 = vst.msk [vmem:[%s134_s27] sm:$0xff] %vm175_vm1, %v261_v40  ;;  %266 = vst.msk [vmem:[%s134_s27 + $0x8] sm:$0xff] %vm175_vm1, %v262_v41 }
  0xf6   : > { %267 = vst.msk [vmem:[%s134_s27 + $0x10] sm:$0xff] %vm175_vm1, %v263_v19  ;;  %268 = vst.msk [vmem:[%s134_s27 + $0x18] sm:$0xff] %vm175_vm1, %v264_v25 }
  0xf7   : > { %472 = shalt.err (!%p469_p10)
}
  0xf8   : > { %s473_s14 = scalar_lea.hbm %s683_s3, 512  ;;  %s477_s21 = scalar_lea.hbm %s733_s1, 1024 }
  0xf9   : > { %p474_p0 = scmp.ne.s32.totalorder %s683_s3, %s473_s14  ;;  %p478_p1 = scmp.lt.s32.totalorder %s683_s3, %s733_s1 }
  0xfa   : > { %p479_p3 = scmp.lt.s32.totalorder %s477_s21, %s473_s14 }
  0xfb   : > { %p475_p2 = pnand %p474_p0, %p742_p12 }
  0xfc   : > { %p480_p6 = por %p479_p3, %p478_p1 }
  0xfd   : > { %p476_p9 = pneg %p475_p2 }
  0xff   : > { %p481_p11 = pnand %p480_p6, %p476_p9 }
 0x101   : > { %484 = shalt.err (!%p481_p11)
}
 0x102   : > { %s529_s26 = smov 128   ;;  %s530_s30 = smov 8  }
 0x103   : > { %381 = dma.vmem_to_hbm [thread:$0]  (%p742_p12), %s685_s28, 512, %s683_s3, %s270_s10, %s529_s26, %s529_s26, %s530_s30  }
 0x104 PF: > { %s298_s17 = sand.u32 1, %s511_s6   ;;  %p743_p13 = scmp.ne.s32.totalorder %s739_s19, 0 }
 0x105   : > { %p744_p4 = scmp.ge.s32.totalorder %s523_s9, 2  ;;  %s299_s25 = scalar_lea.sflag [#allocation4], %s298_s17 }
 0x107   : > { %p388_p5 = pnand %p744_p4, %p743_p13 }
 0x109   : > { %p389_p7 = pneg %p388_p5 }
 0x10b   : > { %506 = dma.done.wait (%p389_p7), %s299_s25, 512  }
 0x10c   : > { %508 = vsyncadd (%p389_p7), %s299_s25, 4294966784  ;;  %p14_p8 = scmp.ge.s32.totalorder %s566_s12, 4   ;;  %s745_s6 = smov %s515_s7 }
 0x10d   : > { %s746_s7 = smov %s519_s8  ;;  %s747_s8 = smov %s578_s15 }
 0x10e   : > { %s748_s9 = smov %s566_s12  ;;  %16 = sbr.rel (!%p14_p8) target bundleno = 5 (0x5), region = 76 }
 0x113   :  { %304 = vsyncpa [#allocation3], 1 }
 0x114   :  { %306 = vsyncpa [#allocation3 + $0x1], 1 }
 0x115   :  { %307 = vsyncpa [#allocation4], 1 }
 0x116   :  { %309 = vsyncpa [#allocation4 + $0x1], 1 }

</bundles_post_ra>
